<compile_context>
chip_gen: v7x
topology: tpu7x:2x2x1
jax: 0.10.0
libtpu: 0.0.40
codegen_flags: <defaults>
</compile_context>

<pallas_src>
import functools

import jax
import jax.numpy as jnp
from jax.experimental import pallas as pl
from jax.experimental.pallas import tpu as pltpu


def _round_up(x, m):
    return ((x + m - 1) // m) * m


def _softplus(x):
    # numerically stable softplus: max(x,0) + log1p(exp(-|x|))
    return jnp.maximum(x, 0.0) + jnp.log1p(jnp.exp(-jnp.abs(x)))


def actor_kernel(x_ref,
                 w1_ref, b1_ref,
                 w2_ref, b2_ref,
                 wh_ref, bh_ref,
                 mu_ref, sg_ref,
                 *, action_dim):
    # Weights decide the MXU-operand dtype (bf16 on the fast path, f32 otherwise).
    dot_dtype = w1_ref.dtype

    x = x_ref[...].astype(dot_dtype)                                   # (TB, F)

    # shared_net: Linear -> ReLU -> Linear -> ReLU (MXU matmuls, f32 accum).
    h1 = jnp.dot(x, w1_ref[...], preferred_element_type=jnp.float32) + b1_ref[...]
    h1 = jnp.maximum(h1, 0.0)                                          # (TB, 64) f32
    h2 = jnp.dot(h1.astype(dot_dtype), w2_ref[...],
                 preferred_element_type=jnp.float32) + b2_ref[...]
    h2 = jnp.maximum(h2, 0.0)                                          # (TB, 64) f32

    # Fused heads: one matmul produces [mu_logits | sigma_logits]  (TB, 2A).
    head = jnp.dot(h2.astype(dot_dtype), wh_ref[...],
                   preferred_element_type=jnp.float32) + bh_ref[...]

    mu_ref[...] = jnp.tanh(head[:, :action_dim])                       # (TB, A)
    sg_ref[...] = _softplus(head[:, action_dim:]) + 1e-4               # (TB, A)


def pack_params(params, *, use_bf16=True):
    """Hoisted per-call work: pack the two heads and (optionally) cast weights
    to bf16 once.  Biases stay f32 (added to the f32 accumulator)."""
    wh = jnp.concatenate([params["wmu"], params["wsg"]], axis=1)       # (64, 2A)
    bh = jnp.concatenate([params["bmu"], params["bsg"]], axis=1)       # (1, 2A)
    wdt = jnp.bfloat16 if use_bf16 else jnp.float32
    return dict(
        w1=params["w1"].astype(wdt), b1=params["b1"].astype(jnp.float32),
        w2=params["w2"].astype(wdt), b2=params["b2"].astype(jnp.float32),
        wh=wh.astype(wdt), bh=bh.astype(jnp.float32),
    )


def actor_forward(x, packed, *, block_b=2048):
    """x: (B, F) float32; packed: output of pack_params().
    Returns (mu, sigma), each (B, A) float32."""
    B, F = x.shape
    hidden = packed["w1"].shape[1]
    A = packed["wh"].shape[1] // 2

    # Pad the batch to a multiple of 8 sublanes at most (cheap; often a no-op).
    B_pad = _round_up(B, 8)
    if B_pad != B:
        x = jnp.pad(x, ((0, B_pad - B), (0, 0)))

    # Batch tile: multiple of 8; capped at ceil(B/2) so the grid has >= 2 steps
    # whenever B > 8 (lets the "parallel" axis shard across v7x's 2 TCs).
    TB = max(8, min(block_b, _round_up(pl.cdiv(B_pad, 2), 8)))
    grid = (pl.cdiv(B_pad, TB),)

    # VMEM budget: actual footprint + modest slack (no inflated floor).
    wbytes = jnp.dtype(packed["w1"].dtype).itemsize
    weight_bytes = (F * hidden + hidden * hidden + hidden * 2 * A) * wbytes \
        + (2 * hidden + 2 * A) * 4
    vmem_bytes = (2 * TB * F * 4                 # double-buffered x tiles (f32)
                  + 2 * 2 * TB * A * 4           # double-buffered mu & sigma tiles
                  + 2 * weight_bytes             # resident weights (buffered)
                  + TB * (2 * hidden + 2 * A) * (4 + wbytes)  # h1/h2/head (+casts)
                  + (4 << 20))                   # compiler scratch slack
    vmem_bytes = min(int(vmem_bytes), 48 << 20)

    mu, sigma = pl.pallas_call(
        functools.partial(actor_kernel, action_dim=A),
        out_shape=(jax.ShapeDtypeStruct((B_pad, A), jnp.float32),
                   jax.ShapeDtypeStruct((B_pad, A), jnp.float32)),
        grid=grid,
        in_specs=[
            pl.BlockSpec((TB, F), lambda i: (i, 0)),            # x: tiled over batch
            pl.BlockSpec((F, hidden), lambda i: (0, 0)),        # w1: resident
            pl.BlockSpec((1, hidden), lambda i: (0, 0)),        # b1
            pl.BlockSpec((hidden, hidden), lambda i: (0, 0)),   # w2
            pl.BlockSpec((1, hidden), lambda i: (0, 0)),        # b2
            pl.BlockSpec((hidden, 2 * A), lambda i: (0, 0)),    # packed head weight
            pl.BlockSpec((1, 2 * A), lambda i: (0, 0)),         # packed head bias
        ],
        out_specs=(pl.BlockSpec((TB, A), lambda i: (i, 0)),     # mu
                   pl.BlockSpec((TB, A), lambda i: (i, 0))),    # sigma
        compiler_params=pltpu.CompilerParams(
            dimension_semantics=("parallel",),
            vmem_limit_bytes=vmem_bytes,
        ),
    )(x, packed["w1"], packed["b1"], packed["w2"], packed["b2"],
      packed["wh"], packed["bh"])

    if B_pad != B:
        mu, sigma = mu[:B], sigma[:B]
    return mu, sigma


def init_params(key, feature_dim, action_dim, hidden=64):
    """Deterministic init mimicking PyTorch defaults.
    Linear default: U(-1/sqrt(fan_in), 1/sqrt(fan_in)) for weight & bias.
    mu/sigma weights overridden with U(-0.001, 0.001) as in the module."""
    ks = jax.random.split(key, 8)

    def lin(kw, kb, fan_in, fan_out, w_range=None):
        bound = 1.0 / jnp.sqrt(fan_in)
        wr = bound if w_range is None else w_range
        # stored as (in, out) i.e. transposed vs torch's (out, in)
        w = jax.random.uniform(kw, (fan_in, fan_out), jnp.float32, -wr, wr)
        b = jax.random.uniform(kb, (1, fan_out), jnp.float32, -bound, bound)
        return w, b

    w1, b1 = lin(ks[0], ks[1], feature_dim, hidden)
    w2, b2 = lin(ks[2], ks[3], hidden, hidden)
    wmu, bmu = lin(ks[4], ks[5], hidden, action_dim, w_range=0.001)
    wsg, bsg = lin(ks[6], ks[7], hidden, action_dim, w_range=0.001)
    return dict(w1=w1, b1=b1, w2=w2, b2=b2,
                wmu=wmu, bmu=bmu, wsg=wsg, bsg=bsg)


def reference_forward(x, p):
    h = jnp.maximum(x @ p["w1"] + p["b1"], 0.0)
    h = jnp.maximum(h @ p["w2"] + p["b2"], 0.0)
    mu = jnp.tanh(h @ p["wmu"] + p["bmu"])
    sigma = jax.nn.softplus(h @ p["wsg"] + p["bsg"]) + 1e-4
    return mu, sigma


if __name__ == "__main__":
    key = jax.random.PRNGKey(0)
    feature_dim, action_dim, batch = 32, 8, 8

    kx, kp = jax.random.split(key)
    x = jax.random.normal(kx, (batch, feature_dim), jnp.float32)
    params = init_params(kp, feature_dim, action_dim)

    # ---- f32 MXU-operand path: bit-for-bit-ish check against reference ----
    p32 = pack_params(params, use_bf16=False)
    mu, sigma = actor_forward(x, p32)
    jax.block_until_ready((mu, sigma))
    mu_ref, sigma_ref = reference_forward(x, params)
    assert mu.shape == (batch, action_dim) and sigma.shape == (batch, action_dim)
    assert jnp.allclose(mu, mu_ref, atol=1e-5), "f32 mu mismatch"
    assert jnp.allclose(sigma, sigma_ref, atol=1e-5), "f32 sigma mismatch"
    assert bool(jnp.all(sigma > 0.0)), "sigma must be positive"

    # ---- bf16 MXU-operand path (default perf path): loose tolerance ----
    pbf = pack_params(params, use_bf16=True)
    mu_b, sg_b = actor_forward(x, pbf)
    jax.block_until_ready((mu_b, sg_b))
    assert jnp.allclose(mu_b, mu_ref, atol=1e-2, rtol=1e-2), "bf16 mu mismatch"
    assert jnp.allclose(sg_b, sigma_ref, atol=1e-2, rtol=1e-2), "bf16 sigma mismatch"
    assert bool(jnp.all(sg_b > 0.0)), "bf16 sigma must be positive"

    # ---- non-multiple-of-8 batch: exercises the pad-to-8 + slice path ----
    x6 = x[:6]
    mu6, sg6 = actor_forward(x6, p32)
    jax.block_until_ready((mu6, sg6))
    assert mu6.shape == (6, action_dim) and sg6.shape == (6, action_dim)
    assert jnp.allclose(mu6, mu_ref[:6], atol=1e-5), "pad-path mu mismatch"
    assert jnp.allclose(sg6, sigma_ref[:6], atol=1e-5), "pad-path sigma mismatch"

    # ---- larger batch: multi-step grid with a partial boundary block ----
    big_b = 1000
    xb = jax.random.normal(kx, (big_b, feature_dim), jnp.float32)
    mu_big, sg_big = actor_forward(xb, pbf)
    jax.block_until_ready((mu_big, sg_big))
    mu_br, sg_br = reference_forward(xb, params)
    assert mu_big.shape == (big_b, action_dim)
    assert jnp.allclose(mu_big, mu_br, atol=1e-2, rtol=1e-2), "big-batch mu mismatch"
    assert jnp.allclose(sg_big, sg_br, atol=1e-2, rtol=1e-2), "big-batch sigma mismatch"

    print("KERNEL_OK")
</pallas_src>

<mosaic_0001>
module attributes {stable_mosaic.version = 11 : i64} {
  func.func @actor_kernel(%arg0: i32, %arg1: memref<8x32xf32, #tpu.memory_space<vmem>>, %arg2: memref<32x64xf32, #tpu.memory_space<vmem>>, %arg3: memref<1x64xf32, #tpu.memory_space<vmem>>, %arg4: memref<64x64xf32, #tpu.memory_space<vmem>>, %arg5: memref<1x64xf32, #tpu.memory_space<vmem>>, %arg6: memref<64x16xf32, #tpu.memory_space<vmem>>, %arg7: memref<1x16xf32, #tpu.memory_space<vmem>>, %arg8: memref<8x8xf32, #tpu.memory_space<vmem>>, %arg9: memref<8x8xf32, #tpu.memory_space<vmem>>) attributes {dimension_semantics = [#tpu.dimension_semantics<parallel>], iteration_bounds = array<i64: 1>, scalar_prefetch = 0 : i64, scratch_operands = 0 : i64, tpu.core_type = #tpu.core_type<tc>, window_params = [{transform_indices = @transform_0, window_bounds = array<i64: 8, 32>}, {pipeline_mode = #tpu.pipeline_mode<synchronous>, transform_indices = @transform_1, window_bounds = array<i64: 32, 64>}, {pipeline_mode = #tpu.pipeline_mode<synchronous>, transform_indices = @transform_2, window_bounds = array<i64: 1, 64>}, {pipeline_mode = #tpu.pipeline_mode<synchronous>, transform_indices = @transform_3, window_bounds = array<i64: 64, 64>}, {pipeline_mode = #tpu.pipeline_mode<synchronous>, transform_indices = @transform_4, window_bounds = array<i64: 1, 64>}, {pipeline_mode = #tpu.pipeline_mode<synchronous>, transform_indices = @transform_5, window_bounds = array<i64: 64, 16>}, {pipeline_mode = #tpu.pipeline_mode<synchronous>, transform_indices = @transform_6, window_bounds = array<i64: 1, 16>}, {transform_indices = @transform_7, window_bounds = array<i64: 8, 8>}, {transform_indices = @transform_8, window_bounds = array<i64: 8, 8>}]} {
    %c0 = arith.constant 0 : index
    %c0_0 = arith.constant 0 : index
    %0 = vector.load %arg1[%c0, %c0_0] : memref<8x32xf32, #tpu.memory_space<vmem>>, vector<8x32xf32>
    %c0_1 = arith.constant 0 : index
    %c0_2 = arith.constant 0 : index
    %1 = vector.load %arg2[%c0_1, %c0_2] : memref<32x64xf32, #tpu.memory_space<vmem>>, vector<32x64xf32>
    %cst = arith.constant dense<0.000000e+00> : vector<8x64xf32>
    %2 = tpu.matmul %0, %1, %cst {dimension_numbers = #tpu.dot_dimension_numbers<[1], [0], [0], [1], [0, 0, 1, 1], [], []>} : vector<8x32xf32>, vector<32x64xf32>, vector<8x64xf32> -> vector<8x64xf32>
    %c0_3 = arith.constant 0 : index
    %c0_4 = arith.constant 0 : index
    %3 = vector.load %arg3[%c0_3, %c0_4] : memref<1x64xf32, #tpu.memory_space<vmem>>, vector<1x64xf32>
    %4 = vector.broadcast %3 : vector<1x64xf32> to vector<8x64xf32>
    %5 = arith.addf %2, %4 : vector<8x64xf32>
    %cst_5 = arith.constant 0.000000e+00 : f32
    %6 = vector.broadcast %cst_5 : f32 to vector<8x64xf32>
    %7 = arith.maximumf %5, %6 : vector<8x64xf32>
    %c0_6 = arith.constant 0 : index
    %c0_7 = arith.constant 0 : index
    %8 = vector.load %arg4[%c0_6, %c0_7] : memref<64x64xf32, #tpu.memory_space<vmem>>, vector<64x64xf32>
    %cst_8 = arith.constant dense<0.000000e+00> : vector<8x64xf32>
    %9 = tpu.matmul %7, %8, %cst_8 {dimension_numbers = #tpu.dot_dimension_numbers<[1], [0], [0], [1], [0, 0, 1, 1], [], []>} : vector<8x64xf32>, vector<64x64xf32>, vector<8x64xf32> -> vector<8x64xf32>
    %c0_9 = arith.constant 0 : index
    %c0_10 = arith.constant 0 : index
    %10 = vector.load %arg5[%c0_9, %c0_10] : memref<1x64xf32, #tpu.memory_space<vmem>>, vector<1x64xf32>
    %11 = vector.broadcast %10 : vector<1x64xf32> to vector<8x64xf32>
    %12 = arith.addf %9, %11 : vector<8x64xf32>
    %cst_11 = arith.constant 0.000000e+00 : f32
    %13 = vector.broadcast %cst_11 : f32 to vector<8x64xf32>
    %14 = arith.maximumf %12, %13 : vector<8x64xf32>
    %c0_12 = arith.constant 0 : index
    %c0_13 = arith.constant 0 : index
    %15 = vector.load %arg6[%c0_12, %c0_13] : memref<64x16xf32, #tpu.memory_space<vmem>>, vector<64x16xf32>
    %cst_14 = arith.constant dense<0.000000e+00> : vector<8x16xf32>
    %16 = tpu.matmul %14, %15, %cst_14 {dimension_numbers = #tpu.dot_dimension_numbers<[1], [0], [0], [1], [0, 0, 1, 1], [], []>} : vector<8x64xf32>, vector<64x16xf32>, vector<8x16xf32> -> vector<8x16xf32>
    %c0_15 = arith.constant 0 : index
    %c0_16 = arith.constant 0 : index
    %17 = vector.load %arg7[%c0_15, %c0_16] : memref<1x16xf32, #tpu.memory_space<vmem>>, vector<1x16xf32>
    %18 = vector.broadcast %17 : vector<1x16xf32> to vector<8x16xf32>
    %19 = arith.addf %16, %18 : vector<8x16xf32>
    %20 = vector.extract_strided_slice %19 {offsets = [0, 0], sizes = [8, 8], strides = [1, 1]} : vector<8x16xf32> to vector<8x8xf32>
    %21 = math.tanh %20 : vector<8x8xf32>
    %c0_17 = arith.constant 0 : index
    %c0_18 = arith.constant 0 : index
    %22 = vector.load %arg8[%c0_17, %c0_18] : memref<8x8xf32, #tpu.memory_space<vmem>>, vector<8x8xf32>
    tpu.vector_store %arg8[%c0_17, %c0_18], %21 {strides = array<i32>} : memref<8x8xf32, #tpu.memory_space<vmem>>, vector<8x8xf32>,
    %23 = vector.extract_strided_slice %19 {offsets = [0, 8], sizes = [8, 8], strides = [1, 1]} : vector<8x16xf32> to vector<8x8xf32>
    %cst_19 = arith.constant 0.000000e+00 : f32
    %24 = vector.broadcast %cst_19 : f32 to vector<8x8xf32>
    %25 = arith.maximumf %23, %24 : vector<8x8xf32>
    %26 = math.absf %23 : vector<8x8xf32>
    %cst_20 = arith.constant 0.000000e+00 : f32
    %27 = vector.broadcast %cst_20 : f32 to vector<8x8xf32>
    %28 = arith.subf %27, %26 : vector<8x8xf32>
    %29 = math.exp %28 : vector<8x8xf32>
    %30 = math.log1p %29 : vector<8x8xf32>
    %31 = arith.addf %25, %30 : vector<8x8xf32>
    %cst_21 = arith.constant 9.99999974E-5 : f32
    %32 = vector.broadcast %cst_21 : f32 to vector<8x8xf32>
    %33 = arith.addf %31, %32 : vector<8x8xf32>
    %c0_22 = arith.constant 0 : index
    %c0_23 = arith.constant 0 : index
    %34 = vector.load %arg9[%c0_22, %c0_23] : memref<8x8xf32, #tpu.memory_space<vmem>>, vector<8x8xf32>
    tpu.vector_store %arg9[%c0_22, %c0_23], %33 {strides = array<i32>} : memref<8x8xf32, #tpu.memory_space<vmem>>, vector<8x8xf32>,
    return
  }
  func.func @transform_0(%arg0: i32) -> (i32, i32) {
    %c0_i32 = arith.constant 0 : i32
    %c0_i32_0 = arith.constant 0 : i32
    return %arg0, %c0_i32 : i32, i32
  }
  func.func @transform_1(%arg0: i32) -> (i32, i32) {
    %c0_i32 = arith.constant 0 : i32
    %c0_i32_0 = arith.constant 0 : i32
    %c0_i32_1 = arith.constant 0 : i32
    return %c0_i32, %c0_i32_0 : i32, i32
  }
  func.func @transform_2(%arg0: i32) -> (i32, i32) {
    %c0_i32 = arith.constant 0 : i32
    %c0_i32_0 = arith.constant 0 : i32
    %c0_i32_1 = arith.constant 0 : i32
    return %c0_i32, %c0_i32_0 : i32, i32
  }
  func.func @transform_3(%arg0: i32) -> (i32, i32) {
    %c0_i32 = arith.constant 0 : i32
    %c0_i32_0 = arith.constant 0 : i32
    %c0_i32_1 = arith.constant 0 : i32
    return %c0_i32, %c0_i32_0 : i32, i32
  }
  func.func @transform_4(%arg0: i32) -> (i32, i32) {
    %c0_i32 = arith.constant 0 : i32
    %c0_i32_0 = arith.constant 0 : i32
    %c0_i32_1 = arith.constant 0 : i32
    return %c0_i32, %c0_i32_0 : i32, i32
  }
  func.func @transform_5(%arg0: i32) -> (i32, i32) {
    %c0_i32 = arith.constant 0 : i32
    %c0_i32_0 = arith.constant 0 : i32
    %c0_i32_1 = arith.constant 0 : i32
    return %c0_i32, %c0_i32_0 : i32, i32
  }
  func.func @transform_6(%arg0: i32) -> (i32, i32) {
    %c0_i32 = arith.constant 0 : i32
    %c0_i32_0 = arith.constant 0 : i32
    %c0_i32_1 = arith.constant 0 : i32
    return %c0_i32, %c0_i32_0 : i32, i32
  }
  func.func @transform_7(%arg0: i32) -> (i32, i32) {
    %c0_i32 = arith.constant 0 : i32
    %c0_i32_0 = arith.constant 0 : i32
    return %arg0, %c0_i32 : i32, i32
  }
  func.func @transform_8(%arg0: i32) -> (i32, i32) {
    %c0_i32 = arith.constant 0 : i32
    %c0_i32_0 = arith.constant 0 : i32
    return %arg0, %c0_i32 : i32, i32
  }
}

</mosaic_0001>

<bundles_post_ra>
// kernel: tpu_custom_call.1
= control target key start
LH: loop header
LB: loop body
LE: loop exit
PB: predicated region body
PF: predicated region fallthrough
CT: control target
= control target key end

     0   :  { %14 = vsyncpa [#allocation3], 0  ;;  %s712_s0 = inlined_call_operand.vmem [shape: f32[8,32], index: 0, kind: input, shape index: {}]   ;;  %s713_s1 = inlined_call_operand.hbm [shape: f32[32,64], index: 1, kind: input, shape index: {}]   ;;  %s714_s2 = inlined_call_operand.vmem [shape: f32[1,64], index: 2, kind: input, shape index: {}]   ;;  %s715_s3 = inlined_call_operand.vmem [shape: f32[64,64], index: 3, kind: input, shape index: {}]   ;;  %s716_s4 = inlined_call_operand.vmem [shape: f32[1,64], index: 4, kind: input, shape index: {}]   ;;  %s717_s5 = inlined_call_operand.vmem [shape: f32[64,16], index: 5, kind: input, shape index: {}]   ;;  %s718_s6 = inlined_call_operand.vmem [shape: f32[1,16], index: 6, kind: input, shape index: {}]   ;;  %s719_s7 = inlined_call_operand.hbm [shape: f32[8,8], index: 7, kind: output, shape index: {0}]   ;;  %s720_s8 = inlined_call_operand.hbm [shape: f32[8,8], index: 8, kind: output, shape index: {1}]  }
   0x1   :  { %15 = vsyncpa [#allocation4], 0 }
   0x2   :  { %16 = vsyncpa [#allocation7], 0  ;;  %s557_s27 = smov [#allocation2]   ;;  %s485_s9 = scalar_lea.hbm %s713_s1, 512 }
   0x3   :  { %s24_s28 = sshll.u32 %s557_s27, 4  ;;  %p486_p0 = scmp.ne.s32.totalorder %s713_s1, %s485_s9  ;;  %s25_s28 = int_to_ptr.vmem [resolvable:$true] %s24_s28 }
   0x4   :  { %p489_p1 = scmp.lt.u32.totalorder %s485_s9, %s713_s1 }
   0x6   :  { %p491_p2 = pnand %p489_p1, %p486_p0 }
   0x8   :  { %494 = shalt.err (!%p491_p2)
}
   0x9   :  { %s495_s14 = scalar_lea.vmem %s25_s28, 512  ;;  %p500_p4 = scmp.lt.s32.totalorder %s25_s28, %s25_s28 }
   0xa   :  { %p496_p3 = scmp.ne.s32.totalorder %s25_s28, %s495_s14  ;;  %p501_p5 = scmp.lt.s32.totalorder %s495_s14, %s495_s14 }
   0xc   :  { %p502_p6 = por %p501_p5, %p500_p4 }
   0xe   :  { %p503_p7 = pnand %p502_p6, %p496_p3 }
  0x10   :  { %506 = shalt.err (!%p503_p7)
}
  0x11   :  { %s558_s15 = smov 128   ;;  %s559_s16 = smov 8  }
  0x12   :  { %30 = dma.hbm_to_vmem [thread:$0]  %s713_s1, 512, %s25_s28, [#allocation3], %s558_s15, %s558_s15, %s559_s16  }
  0x13   :  { %551 = dma.done.wait [#allocation3], 512  }
  0x14   :  { %552 = vsyncadd [#allocation3], 4294966784  ;;  %v560_v0 = vmov 0.0|0.0   ;;  %vm561_vm0 = vmmov 0   ;;  %v562_v1 = vmov 0.0   ;;  %v45_v2 = vld [vmem:[#allocation2] sm:$0xff] }
  0x15   :  { %440 = vmatprep.subr.bf16.mxu0 %v560_v0  ;;  %399 = vmatprep.mubr.msk.f32.mxu0 %vm561_vm0, %v562_v1  ;;  %v46_v3 = vld [vmem:[#allocation2 + $0x8] sm:$0xff]  ;;  %v47_v4 = vld [vmem:[#allocation2 + $0x10] sm:$0xff]  ;;  %v48_v6 = vld [vmem:[#allocation2 + $0x18] sm:$0xff]  ;;  %vm56_vm1 = vcmask 261120   ;;  %vm146_vm2 = vcmask 523264   ;;  %vm310_vm3 = vcmask 64512  }
  0x16   :  { %446 = vmatprep.subr.bf16.mxu1 %v560_v0  ;;  %418 = vmatprep.mubr.msk.f32.mxu1 %vm561_vm0, %v562_v1  ;;  %v441_v5 = vpack.c.bf16 %v46_v3, %v45_v2  ;;  %v131_v7 = vld [vmem:[%s715_s3] sm:$0xff]  ;;  %v132_v8 = vld [vmem:[%s715_s3 + $0x8] sm:$0xff]  ;;  %v133_v9 = vld [vmem:[%s715_s3 + $0x10] sm:$0xff]  ;;  %v444_v11 = vpack.c.bf16 %v48_v6, %v47_v4 }
  0x17   :  { %v134_v10 = vld [vmem:[%s715_s3 + $0x18] sm:$0xff]  ;;  %v447_v12 = vpack.c.bf16 %v132_v8, %v131_v7  ;;  %v135_v14 = vld [vmem:[%s715_s3 + $0x20] sm:$0xff]  ;;  %v136_v15 = vld [vmem:[%s715_s3 + $0x28] sm:$0xff] }
  0x18   :  { %442 = vmatpush3.bf16.msra.mxu0 %v441_v5  ;;  %v450_v13 = vpack.c.bf16 %v134_v10, %v133_v9  ;;  %v44_v16 = vld [vmem:[%s712_s0] sm:$0xff]  ;;  %v453_v17 = vpack.c.bf16 %v136_v15, %v135_v14  ;;  %v137_v18 = vld [vmem:[%s715_s3 + $0x30] sm:$0xff]  ;;  %v138_v19 = vld [vmem:[%s715_s3 + $0x38] sm:$0xff] }
  0x19   :  { %443 = vmatprep.subr.bf16.mxu0 %v560_v0  ;;  %448 = vmatpush3.bf16.msra.mxu1 %v447_v12  ;;  %v456_v20 = vpack.c.bf16 %v138_v19, %v137_v18  ;;  %v221_v21 = vld [vmem:[%s717_s5] sm:$0xff]  ;;  %v222_v22 = vld [vmem:[%s717_s5 + $0x8] sm:$0xff]  ;;  %v223_v23 = vld [vmem:[%s717_s5 + $0x10] sm:$0xff] }
  0x1a   :  { %449 = vmatprep.subr.bf16.mxu1 %v560_v0  ;;  %v459_v24 = vpack.c.bf16 %v222_v22, %v221_v21  ;;  %v224_v25 = vld [vmem:[%s717_s5 + $0x18] sm:$0xff]  ;;  %v225_v27 = vld [vmem:[%s717_s5 + $0x20] sm:$0xff]  ;;  %v226_v28 = vld [vmem:[%s717_s5 + $0x28] sm:$0xff] }
  0x1b   :  { %v462_v26 = vpack.c.bf16 %v224_v25, %v223_v23  ;;  %v465_v29 = vpack.c.bf16 %v226_v28, %v225_v27  ;;  %v362_v30 = vld [vmem:[%s714_s2] ss:$0 sm:$0xff]  ;;  %v227_v35 = vld [vmem:[%s717_s5 + $0x30] sm:$0xff]  ;;  %v228_v36 = vld [vmem:[%s717_s5 + $0x38] sm:$0xff] }
  0x1c   :  { %445 = vmatpush3.bf16.msra.mxu0 %v444_v11  ;;  %v468_v37 = vpack.c.bf16 %v228_v36, %v227_v35  ;;  %v364_v38 = vld [vmem:[%s716_s4] ss:$0 sm:$0xff]  ;;  %s563_s4 = smov [#allocation5]  }
  0x1d   :  { %458 = vmatprep.subr.bf16.mxu0 %v560_v0  ;;  %451 = vmatpush3.bf16.msra.mxu1 %v450_v13  ;;  %v366_v43 = vld [vmem:[%s718_s6] ss:$0 sm:$0xff]  ;;  %s339_s5 = sshll.u32 %s563_s4, 4  ;;  %s340_s5 = int_to_ptr.vmem [resolvable:$true] %s339_s5 }
  0x1e   :  { %452 = vmatprep.subr.bf16.mxu1 %v560_v0  ;;  %s507_s6 = scalar_lea.vmem %s340_s5, 128  ;;  %p512_p9 = scmp.lt.s32.totalorder %s340_s5, %s340_s5 }
  0x1f   :  { %400 = vmatmul.mubr.msk.f32.vlgmr.msra.gmra.mrb[0].mxu0 %vm56_vm1, %v44_v16  ;;  %p508_p8 = scmp.ne.s32.totalorder %s340_s5, %s507_s6  ;;  %p513_p10 = scmp.lt.s32.totalorder %s507_s6, %s507_s6 }
  0x20   :  { %437 = vmatprep.mubr.msk.f32.mxu0 %vm561_vm0, %v562_v1  ;;  %460 = vmatpush3.bf16.msra.mxu0 %v459_v24 }
  0x21   :  { %454 = vmatpush3.bf16.msra.mxu1 %v453_v17  ;;  %461 = vmatprep.subr.bf16.mxu0 %v560_v0  ;;  %p514_p11 = por %p513_p10, %p512_p9 }
  0x22   :  { %455 = vmatprep.subr.bf16.mxu1 %v560_v0 }
  0x23   :  { %p515_p12 = pnand %p514_p11, %p508_p8 }
  0x24   :  { %463 = vmatpush3.bf16.msra.mxu0 %v462_v26 }
  0x25   :  { %457 = vmatpush3.bf16.msra.mxu1 %v456_v20  ;;  %464 = vmatprep.subr.bf16.mxu0 %v560_v0 }
  0x28   :  { %466 = vmatpush3.bf16.msra.mxu0 %v465_v29 }
  0x29   :  { %467 = vmatprep.subr.bf16.mxu0 %v560_v0 }
  0x2c   :  { %469 = vmatpush3.bf16.msra.mxu0 %v468_v37 }
  0xf2   :  { %v126_v31 = vpop.f32.mrb[0].mxu0 }
  0xf3   :  { %v127_v32 = vadd.f32 %v362_v30, %v126_v31  ;;  %v401_v33 = vpop.f32.mrb[1].mxu0 }
  0xf5   :  { %v130_v34 = vmax.f32 %v127_v32, 0.0 }
  0xf7   :  { %419 = vmatmul.mubr.msk.f32.vlgmr.msra.gmra.mrb[0].mxu1 %vm146_vm2, %v130_v34 }
 0x1ca   :  { %v216_v39 = vpop.f32.mrb[0].mxu1 }
 0x1cb   :  { %v217_v40 = vadd.f32 %v364_v38, %v216_v39  ;;  %v420_v41 = vpop.f32.mrb[1].mxu1 }
 0x1cd   :  { %v220_v42 = vmax.f32 %v217_v40, 0.0 }
 0x1cf   :  { %438 = vmatmul.mubr.msk.f32.vlgmr.msra.gmra.mrb[2].mxu0 %vm146_vm2, %v220_v42 }
 0x2a2   :  { %v305_v44 = vpop.f32.mrb[2].mxu0 }
 0x2a3   :  { %v306_v45 = vadd.f32 %v366_v43, %v305_v44  ;;  %v439_v46 = vpop.f32.mrb[3].mxu0 }
 0x2a5   :  { %479 = vtanh.f32 %v306_v45  ;;  %v313_v47 = vand.u32 2147483647, %v306_v45 }
 0x2a7   :  { %v314_v48 = vsub.f32 0.0, %v313_v47 }
 0x2a9   :  { %v315_v49 = vmul.f32 1.442695, %v314_v48 }
 0x2ab   :  { %481 = vpow2.f32 %v315_v49 }
 0x2af   :  { %v480_v50 = vpop.eup %479 }
 0x2b0   :  { %311 = vst.msk [vmem:[#allocation5] sm:$0xff] %vm310_vm3, %v480_v50 }
 0x2b5   :  { %v482_v51 = vpop.eup %481 }
 0x2b6   :  { %v317_v52 = vadd.f32 1.0, %v482_v51  ;;  %v320_v53 = vmul.f32 -0.5, %v482_v51 }
 0x2b8   :  { %483 = vlog2.f32 %v317_v52 }
 0x2b9   :  { %518 = shalt.err (!%p515_p12)
}
 0x2ba   :  { %s519_s12 = scalar_lea.hbm %s719_s7, 128 }
 0x2bb   :  { %p520_p13 = scmp.ne.s32.totalorder %s719_s7, %s519_s12  ;;  %p523_p0 = scmp.lt.u32.totalorder %s519_s12, %s719_s7 }
 0x2bd   :  { %p525_p1 = pnand %p523_p0, %p520_p13 }
 0x2bf   :  { %528 = shalt.err (!%p525_p1)
}
 0x2c0   :  { %342 = dma.vmem_to_hbm [thread:$0]  %s340_s5, 128, %s719_s7, [#allocation4]   ;;  %v321_v54 = vadd.f32 1.0, %v320_v53  ;;  %v323_v55 = vand.u32 2147483647, %v482_v51  ;;  %v312_v59 = vmax.f32 %v306_v45, 0.0 }
 0x2c1   :  { %s564_s18 = smov 120   ;;  %s565_s19 = smov [#allocation6]  }
 0x2c2   :  { %v484_v56 = vpop.eup %483  ;;  %v322_v58 = vmul.f32 %v482_v51, %v321_v54  ;;  %vm324_vm4 = vcmp.lt.f32.partialorder %v323_v55, 0.0004427343  ;;  %s349_s20 = sshll.u32 %s565_s19, 4  ;;  %s350_s20 = int_to_ptr.vmem [resolvable:$true] %s349_s20 }
 0x2c3   :  { %v319_v57 = vmul.f32 0.6931472, %v484_v56  ;;  %s529_s3 = scalar_lea.vmem %s350_s20, 128  ;;  %p534_p3 = scmp.lt.s32.totalorder %s350_s20, %s350_s20 }
 0x2c4   :  { %p530_p2 = scmp.ne.s32.totalorder %s350_s20, %s529_s3  ;;  %p535_p4 = scmp.lt.s32.totalorder %s529_s3, %s529_s3 }
 0x2c5   :  { %v325_v60 = vsel %vm324_vm4, %v322_v58, %v319_v57 }
 0x2c6   :  { %v326_v61 = vadd.f32 %v325_v60, %v312_v59  ;;  %p536_p5 = por %p535_p4, %p534_p3 }
 0x2c8   :  { %v327_v62 = vadd.f32 0.0001, %v326_v61  ;;  %p537_p6 = pnand %p536_p5, %p530_p2 }
 0x2ca   :  { %329 = vrot.lane.b32.xlu0 %v327_v62, %s564_s18 }
 0x33c   :  { %v330_v63 = vpop.permute.xlu0 %329 }
 0x33d   :  { %332 = vst.msk [vmem:[#allocation6] sm:$0xff] %vm310_vm3, %v330_v63 }
 0x33e   :  { %540 = shalt.err (!%p537_p6)
}
 0x33f   :  { %s541_s21 = scalar_lea.hbm %s720_s8, 128 }
 0x340   :  { %p542_p7 = scmp.ne.s32.totalorder %s720_s8, %s541_s21  ;;  %p545_p8 = scmp.lt.u32.totalorder %s541_s21, %s720_s8 }
 0x342   :  { %p547_p9 = pnand %p545_p8, %p542_p7 }
 0x344   :  { %550 = shalt.err (!%p547_p9)
}
 0x345   :  { %352 = dma.vmem_to_hbm [thread:$0]  %s350_s20, 128, %s720_s8, [#allocation7]  }
 0x346   :  { %553 = dma.done.wait [#allocation4], 128  }
 0x347   :  { %554 = vsyncadd [#allocation4], 4294967168 }
 0x348   :  { %555 = dma.done.wait [#allocation7], 128  }
 0x349   :  { %556 = vsyncadd [#allocation7], 4294967168 }
 0x34a   :  { %359 = vsyncpa [#allocation3], 1 }
 0x34b   :  { %360 = vsyncpa [#allocation4], 1 }
 0x34c   :  { %361 = vsyncpa [#allocation7], 1 }

</bundles_post_ra>
